<compile_context>
chip_gen: v7x
topology: tpu7x:2x2x1
jax: 0.10.0
libtpu: 0.0.40
codegen_flags: <defaults>
</compile_context>

<pallas_src>
import functools

import jax
import jax.numpy as jnp
from jax import lax
from jax.experimental import pallas as pl
from jax.experimental.pallas import tpu as pltpu


def _round_up(n, m):
    return (n + m - 1) // m * m


def _bilstm_ln_kernel(proj_ref, w_rec_ref, gamma_ref, beta_ref, out_ref,
                      h_state, c_state, *, total_steps):
    """One grid step = one chunk of timesteps, both directions fused."""
    two_h = h_state.shape[-1]          # 2H (fused [fwd | bwd] state width)
    chunk = pl.program_id(0)
    tc = proj_ref.shape[0]             # timesteps per chunk (static)

    @pl.when(chunk == 0)
    def _init():
        h_state[...] = jnp.zeros_like(h_state)
        c_state[...] = jnp.zeros_like(c_state)

    # Loop-invariant load hoisted out of the recurrence.
    w_rec = w_rec_ref[...]             # (2H, 8H) block-diagonal recurrent weights

    def step(t, carry):
        h, c = carry                                   # (Bp, 2H) f32 each
        g_x = proj_ref[t]                              # (Bp, 8H) precomputed x-proj + bias
        gates = g_x + jnp.dot(h.astype(w_rec.dtype), w_rec,
                              preferred_element_type=jnp.float32)
        # Full-width activations (EUP), then 2H-wide aligned gate slices.
        sig = jax.nn.sigmoid(gates)
        th = jnp.tanh(gates)
        i_g = sig[:, 0 * two_h:1 * two_h]
        f_g = sig[:, 1 * two_h:2 * two_h]
        g_g = th[:, 2 * two_h:3 * two_h]
        o_g = sig[:, 3 * two_h:4 * two_h]
        c_new = f_g * c + i_g * g_g
        h_new = o_g * jnp.tanh(c_new)
        return h_new, c_new

    carry0 = (h_state[...], c_state[...])
    if total_steps % tc == 0:
        # Static trip count: unroll so the LLO scheduler can interleave the
        # MXU / EUP / VPU work of adjacent iterations.
        unroll = True if tc <= 16 else 4
        h_fin, c_fin = lax.fori_loop(0, tc, step, carry0, unroll=unroll)
    else:
        n_valid = jnp.minimum(tc, total_steps - chunk * tc)
        h_fin, c_fin = lax.fori_loop(0, n_valid, step, carry0)

    h_state[...] = h_fin
    c_state[...] = c_fin

    @pl.when(chunk == pl.num_programs(0) - 1)
    def _finalize():
        out = h_fin                                    # (Bp, 2H) = [h_fwd_T | h_bwd_T]
        mean = jnp.mean(out, axis=-1, keepdims=True)
        var = jnp.mean((out - mean) ** 2, axis=-1, keepdims=True)
        normed = (out - mean) * lax.rsqrt(var + 1e-5)  # LayerNorm eps = 1e-5
        out_ref[...] = (normed * gamma_ref[...] + beta_ref[...]).astype(out_ref.dtype)


def electrode_lstm_forward(x_btd, raw_params, hidden_dim, *,
                           matmul_dtype=jnp.float32, time_chunk=32):
    """x_btd: (B, T, D) -> (B, 2H) = LayerNorm(concat(h_fwd_T, h_bwd_T))."""
    B, T, D = x_btd.shape
    H = hidden_dim
    Bp = _round_up(B, 8)               # pad batch to sublane multiple
    md = matmul_dtype

    # ---- unpack PyTorch-layout parameters --------------------------------
    wih_f = raw_params["weight_ih_l0"]                       # (4H, D)  rows [i,f,g,o]
    whh_f = raw_params["weight_hh_l0"]                       # (4H, H)
    b_f = raw_params["bias_ih_l0"] + raw_params["bias_hh_l0"]            # (4H,)
    wih_b = raw_params["weight_ih_l0_reverse"]
    whh_b = raw_params["weight_hh_l0_reverse"]
    b_b = raw_params["bias_ih_l0_reverse"] + raw_params["bias_hh_l0_reverse"]
    gamma = raw_params["ln_weight"].reshape(1, 2 * H).astype(jnp.float32)
    beta = raw_params["ln_bias"].reshape(1, 2 * H).astype(jnp.float32)

    # ---- hoisted input projection: one big matmul per direction ----------
    x_tbd = jnp.transpose(x_btd, (1, 0, 2)).astype(jnp.float32)     # (T, B, D)
    x_tbd = jnp.pad(x_tbd, ((0, 0), (0, Bp - B), (0, 0)))           # (T, Bp, D)
    proj_f = (jnp.einsum("tbd,dg->tbg", x_tbd.astype(md), wih_f.T.astype(md),
                         preferred_element_type=jnp.float32) + b_f)
    proj_b = (jnp.einsum("tbd,dg->tbg", x_tbd[::-1].astype(md), wih_b.T.astype(md),
                         preferred_element_type=jnp.float32) + b_b)
    # gate-major / direction-minor interleave -> (T, Bp, 8H)
    proj = jnp.stack([proj_f.reshape(T, Bp, 4, H),
                      proj_b.reshape(T, Bp, 4, H)], axis=3).reshape(T, Bp, 8 * H)

    # ---- fused block-diagonal recurrent weight (2H, 8H) ------------------
    wf = jnp.transpose(whh_f.reshape(4, H, H), (2, 0, 1))   # (in=H, gate, out=H)
    wb = jnp.transpose(whh_b.reshape(4, H, H), (2, 0, 1))
    zeros = jnp.zeros((H, 4, H), jnp.float32)
    w_rec = jnp.concatenate(
        [jnp.stack([wf, zeros], axis=2),        # rows 0:H  <- h_fwd
         jnp.stack([zeros, wb], axis=2)],       # rows H:2H <- h_bwd
        axis=0).reshape(2 * H, 8 * H).astype(md)

    # ---- time chunking / streaming ----------------------------------------
    tc = min(time_chunk, T)
    n_chunks = (T + tc - 1) // tc
    t_pad = n_chunks * tc
    if t_pad != T:
        proj = jnp.pad(proj, ((0, t_pad - T), (0, 0), (0, 0)))

    kernel = functools.partial(_bilstm_ln_kernel, total_steps=T)
    out = pl.pallas_call(
        kernel,
        out_shape=jax.ShapeDtypeStruct((Bp, 2 * H), jnp.float32),
        grid_spec=pltpu.PrefetchScalarGridSpec(
            num_scalar_prefetch=0,
            grid=(n_chunks,),
            in_specs=[
                pl.BlockSpec((tc, Bp, 8 * H), lambda c: (c, 0, 0)),   # streamed proj
                pl.BlockSpec((2 * H, 8 * H), lambda c: (0, 0)),        # recurrent W
                pl.BlockSpec((1, 2 * H), lambda c: (0, 0)),            # LN gamma
                pl.BlockSpec((1, 2 * H), lambda c: (0, 0)),            # LN beta
            ],
            out_specs=pl.BlockSpec((Bp, 2 * H), lambda c: (0, 0)),
            scratch_shapes=[
                pltpu.VMEM((Bp, 2 * H), jnp.float32),   # fused h state [fwd|bwd]
                pltpu.VMEM((Bp, 2 * H), jnp.float32),   # fused c state [fwd|bwd]
            ],
        ),
        compiler_params=pltpu.CompilerParams(
            dimension_semantics=("arbitrary",)),
    )(proj, w_rec, gamma, beta)
    return out[:B]


def init_raw_params(key, input_dim, hidden_dim):
    """Deterministic init mirroring nn.LSTM / nn.LayerNorm parameter shapes."""
    D, H = input_dim, hidden_dim
    bound = 1.0 / float(H) ** 0.5
    ks = jax.random.split(key, 8)

    def u(k, shape):
        return jax.random.uniform(k, shape, jnp.float32, -bound, bound)

    return {
        "weight_ih_l0": u(ks[0], (4 * H, D)),
        "weight_hh_l0": u(ks[1], (4 * H, H)),
        "bias_ih_l0": u(ks[2], (4 * H,)),
        "bias_hh_l0": u(ks[3], (4 * H,)),
        "weight_ih_l0_reverse": u(ks[4], (4 * H, D)),
        "weight_hh_l0_reverse": u(ks[5], (4 * H, H)),
        "bias_ih_l0_reverse": u(ks[6], (4 * H,)),
        "bias_hh_l0_reverse": u(ks[7], (4 * H,)),
        "ln_weight": jnp.ones((2 * H,), jnp.float32),
        "ln_bias": jnp.zeros((2 * H,), jnp.float32),
    }


def _reference_forward(x_btd, raw, hidden_dim):
    """Pure-JAX f32 reference mirroring PyTorch semantics."""
    H = hidden_dim
    x_tbd = jnp.transpose(x_btd, (1, 0, 2))

    def direction(x_seq, wih, whh, b):
        def step(carry, x_t):
            h, c = carry
            gates = x_t @ wih.T + h @ whh.T + b
            i = jax.nn.sigmoid(gates[:, :H])
            f = jax.nn.sigmoid(gates[:, H:2 * H])
            g = jnp.tanh(gates[:, 2 * H:3 * H])
            o = jax.nn.sigmoid(gates[:, 3 * H:])
            c = f * c + i * g
            h = o * jnp.tanh(c)
            return (h, c), None

        Bz = x_seq.shape[1]
        h0 = jnp.zeros((Bz, H), jnp.float32)
        (h, _), _ = lax.scan(step, (h0, h0), x_seq)
        return h

    h_f = direction(x_tbd, raw["weight_ih_l0"], raw["weight_hh_l0"],
                    raw["bias_ih_l0"] + raw["bias_hh_l0"])
    h_b = direction(x_tbd[::-1], raw["weight_ih_l0_reverse"],
                    raw["weight_hh_l0_reverse"],
                    raw["bias_ih_l0_reverse"] + raw["bias_hh_l0_reverse"])
    out = jnp.concatenate([h_f, h_b], axis=-1)
    mean = out.mean(-1, keepdims=True)
    var = ((out - mean) ** 2).mean(-1, keepdims=True)
    return ((out - mean) * lax.rsqrt(var + 1e-5) * raw["ln_weight"]
            + raw["ln_bias"])


if __name__ == "__main__":
    B, T, D, H = 2, 8, 16, 32

    key = jax.random.PRNGKey(0)
    k_x, k_p = jax.random.split(key)
    x = jax.random.normal(k_x, (B, T, D), jnp.float32)
    raw = init_raw_params(k_p, D, H)

    ref = jax.block_until_ready(_reference_forward(x, raw, H))

    # f32 matmul path (tight numerical check)
    out = jax.block_until_ready(electrode_lstm_forward(x, raw, H))
    assert out.shape == (B, 2 * H), out.shape
    err = float(jnp.max(jnp.abs(out - ref)))
    assert err < 1e-2, f"f32 path mismatch vs reference: {err}"

    # bf16-operand MXU fast path (f32 accumulation / f32 state) for v6e/v7x
    out_bf16 = jax.block_until_ready(
        electrode_lstm_forward(x, raw, H, matmul_dtype=jnp.bfloat16))
    err_bf16 = float(jnp.max(jnp.abs(out_bf16 - ref)))
    assert err_bf16 < 1e-1, f"bf16 path mismatch vs reference: {err_bf16}"

    print("KERNEL_OK")
</pallas_src>

<mosaic_0001>
module attributes {stable_mosaic.version = 11 : i64} {
  func.func @_bilstm_ln_kernel(%arg0: i32, %arg1: memref<8x8x256xf32, #tpu.memory_space<vmem>>, %arg2: memref<64x256xf32, #tpu.memory_space<vmem>>, %arg3: memref<1x64xf32, #tpu.memory_space<vmem>>, %arg4: memref<1x64xf32, #tpu.memory_space<vmem>>, %arg5: memref<8x64xf32, #tpu.memory_space<vmem>>, %arg6: memref<8x64xf32, #tpu.memory_space<vmem>>, %arg7: memref<8x64xf32, #tpu.memory_space<vmem>>) attributes {dimension_semantics = [#tpu.dimension_semantics<arbitrary>], iteration_bounds = array<i64: 1>, scalar_prefetch = 0 : i64, scratch_operands = 2 : i64, tpu.core_type = #tpu.core_type<tc>, window_params = [{transform_indices = @transform_0, window_bounds = array<i64: 8, 8, 256>}, {pipeline_mode = #tpu.pipeline_mode<synchronous>, transform_indices = @transform_1, window_bounds = array<i64: 64, 256>}, {pipeline_mode = #tpu.pipeline_mode<synchronous>, transform_indices = @transform_2, window_bounds = array<i64: 1, 64>}, {pipeline_mode = #tpu.pipeline_mode<synchronous>, transform_indices = @transform_3, window_bounds = array<i64: 1, 64>}, {pipeline_mode = #tpu.pipeline_mode<synchronous>, transform_indices = @transform_4, window_bounds = array<i64: 8, 64>}]} {
    %c0_i32 = arith.constant 0 : i32
    %0 = arith.cmpi eq, %arg0, %c0_i32 : i32
    %1 = arith.extui %0 : i1 to i32
    %c0_i32_0 = arith.constant 0 : i32
    %2 = arith.cmpi ne, %1, %c0_i32_0 : i32
    scf.if %2 {
      %cst_44 = arith.constant 0.000000e+00 : f32
      %171 = vector.broadcast %cst_44 : f32 to vector<8x64xf32>
      %c0_45 = arith.constant 0 : index
      %c0_46 = arith.constant 0 : index
      %172 = vector.load %arg6[%c0_45, %c0_46] : memref<8x64xf32, #tpu.memory_space<vmem>>, vector<8x64xf32>
      tpu.vector_store %arg6[%c0_45, %c0_46], %171 {strides = array<i32>} : memref<8x64xf32, #tpu.memory_space<vmem>>, vector<8x64xf32>,
      %cst_47 = arith.constant 0.000000e+00 : f32
      %173 = vector.broadcast %cst_47 : f32 to vector<8x64xf32>
      %c0_48 = arith.constant 0 : index
      %c0_49 = arith.constant 0 : index
      %174 = vector.load %arg7[%c0_48, %c0_49] : memref<8x64xf32, #tpu.memory_space<vmem>>, vector<8x64xf32>
      tpu.vector_store %arg7[%c0_48, %c0_49], %173 {strides = array<i32>} : memref<8x64xf32, #tpu.memory_space<vmem>>, vector<8x64xf32>,
    } else {
    }
    %c0 = arith.constant 0 : index
    %c0_1 = arith.constant 0 : index
    %3 = vector.load %arg2[%c0, %c0_1] : memref<64x256xf32, #tpu.memory_space<vmem>>, vector<64x256xf32>
    %c0_2 = arith.constant 0 : index
    %c0_3 = arith.constant 0 : index
    %4 = vector.load %arg6[%c0_2, %c0_3] : memref<8x64xf32, #tpu.memory_space<vmem>>, vector<8x64xf32>
    %c0_4 = arith.constant 0 : index
    %c0_5 = arith.constant 0 : index
    %5 = vector.load %arg7[%c0_4, %c0_5] : memref<8x64xf32, #tpu.memory_space<vmem>>, vector<8x64xf32>
    %c0_i32_6 = arith.constant 0 : i32
    %6 = arith.index_cast %c0_i32_6 : i32 to index
    %c0_7 = arith.constant 0 : index
    %c0_8 = arith.constant 0 : index
    %7 = vector.load %arg1[%6, %c0_7, %c0_8] : memref<8x8x256xf32, #tpu.memory_space<vmem>>, vector<1x8x256xf32>
    %8 = vector.shape_cast %7 : vector<1x8x256xf32> to vector<8x256xf32>
    %cst = arith.constant dense<0.000000e+00> : vector<8x256xf32>
    %9 = tpu.matmul %4, %3, %cst {dimension_numbers = #tpu.dot_dimension_numbers<[1], [0], [0], [1], [0, 0, 1, 1], [], []>} : vector<8x64xf32>, vector<64x256xf32>, vector<8x256xf32> -> vector<8x256xf32>
    %10 = arith.addf %8, %9 : vector<8x256xf32>
    %11 = arith.negf %10 : vector<8x256xf32>
    %12 = math.exp %11 : vector<8x256xf32>
    %cst_9 = arith.constant 1.000000e+00 : f32
    %13 = vector.broadcast %cst_9 : f32 to vector<8x256xf32>
    %14 = arith.addf %13, %12 : vector<8x256xf32>
    %15 = arith.divf %13, %14 : vector<8x256xf32>
    %16 = math.tanh %10 : vector<8x256xf32>
    %17 = vector.extract_strided_slice %15 {offsets = [0, 0], sizes = [8, 64], strides = [1, 1]} : vector<8x256xf32> to vector<8x64xf32>
    %18 = vector.extract_strided_slice %15 {offsets = [0, 64], sizes = [8, 64], strides = [1, 1]} : vector<8x256xf32> to vector<8x64xf32>
    %19 = vector.extract_strided_slice %16 {offsets = [0, 128], sizes = [8, 64], strides = [1, 1]} : vector<8x256xf32> to vector<8x64xf32>
    %20 = vector.extract_strided_slice %15 {offsets = [0, 192], sizes = [8, 64], strides = [1, 1]} : vector<8x256xf32> to vector<8x64xf32>
    %21 = arith.mulf %18, %5 : vector<8x64xf32>
    %22 = arith.mulf %17, %19 : vector<8x64xf32>
    %23 = arith.addf %21, %22 : vector<8x64xf32>
    %24 = math.tanh %23 : vector<8x64xf32>
    %25 = arith.mulf %20, %24 : vector<8x64xf32>
    %c1_i32 = arith.constant 1 : i32
    %26 = arith.index_cast %c1_i32 : i32 to index
    %c0_10 = arith.constant 0 : index
    %c0_11 = arith.constant 0 : index
    %27 = vector.load %arg1[%26, %c0_10, %c0_11] : memref<8x8x256xf32, #tpu.memory_space<vmem>>, vector<1x8x256xf32>
    %28 = vector.shape_cast %27 : vector<1x8x256xf32> to vector<8x256xf32>
    %cst_12 = arith.constant dense<0.000000e+00> : vector<8x256xf32>
    %29 = tpu.matmul %25, %3, %cst_12 {dimension_numbers = #tpu.dot_dimension_numbers<[1], [0], [0], [1], [0, 0, 1, 1], [], []>} : vector<8x64xf32>, vector<64x256xf32>, vector<8x256xf32> -> vector<8x256xf32>
    %30 = arith.addf %28, %29 : vector<8x256xf32>
    %31 = arith.negf %30 : vector<8x256xf32>
    %32 = math.exp %31 : vector<8x256xf32>
    %cst_13 = arith.constant 1.000000e+00 : f32
    %33 = vector.broadcast %cst_13 : f32 to vector<8x256xf32>
    %34 = arith.addf %33, %32 : vector<8x256xf32>
    %35 = arith.divf %33, %34 : vector<8x256xf32>
    %36 = math.tanh %30 : vector<8x256xf32>
    %37 = vector.extract_strided_slice %35 {offsets = [0, 0], sizes = [8, 64], strides = [1, 1]} : vector<8x256xf32> to vector<8x64xf32>
    %38 = vector.extract_strided_slice %35 {offsets = [0, 64], sizes = [8, 64], strides = [1, 1]} : vector<8x256xf32> to vector<8x64xf32>
    %39 = vector.extract_strided_slice %36 {offsets = [0, 128], sizes = [8, 64], strides = [1, 1]} : vector<8x256xf32> to vector<8x64xf32>
    %40 = vector.extract_strided_slice %35 {offsets = [0, 192], sizes = [8, 64], strides = [1, 1]} : vector<8x256xf32> to vector<8x64xf32>
    %41 = arith.mulf %38, %23 : vector<8x64xf32>
    %42 = arith.mulf %37, %39 : vector<8x64xf32>
    %43 = arith.addf %41, %42 : vector<8x64xf32>
    %44 = math.tanh %43 : vector<8x64xf32>
    %45 = arith.mulf %40, %44 : vector<8x64xf32>
    %c2_i32 = arith.constant 2 : i32
    %46 = arith.index_cast %c2_i32 : i32 to index
    %c0_14 = arith.constant 0 : index
    %c0_15 = arith.constant 0 : index
    %47 = vector.load %arg1[%46, %c0_14, %c0_15] : memref<8x8x256xf32, #tpu.memory_space<vmem>>, vector<1x8x256xf32>
    %48 = vector.shape_cast %47 : vector<1x8x256xf32> to vector<8x256xf32>
    %cst_16 = arith.constant dense<0.000000e+00> : vector<8x256xf32>
    %49 = tpu.matmul %45, %3, %cst_16 {dimension_numbers = #tpu.dot_dimension_numbers<[1], [0], [0], [1], [0, 0, 1, 1], [], []>} : vector<8x64xf32>, vector<64x256xf32>, vector<8x256xf32> -> vector<8x256xf32>
    %50 = arith.addf %48, %49 : vector<8x256xf32>
    %51 = arith.negf %50 : vector<8x256xf32>
    %52 = math.exp %51 : vector<8x256xf32>
    %cst_17 = arith.constant 1.000000e+00 : f32
    %53 = vector.broadcast %cst_17 : f32 to vector<8x256xf32>
    %54 = arith.addf %53, %52 : vector<8x256xf32>
    %55 = arith.divf %53, %54 : vector<8x256xf32>
    %56 = math.tanh %50 : vector<8x256xf32>
    %57 = vector.extract_strided_slice %55 {offsets = [0, 0], sizes = [8, 64], strides = [1, 1]} : vector<8x256xf32> to vector<8x64xf32>
    %58 = vector.extract_strided_slice %55 {offsets = [0, 64], sizes = [8, 64], strides = [1, 1]} : vector<8x256xf32> to vector<8x64xf32>
    %59 = vector.extract_strided_slice %56 {offsets = [0, 128], sizes = [8, 64], strides = [1, 1]} : vector<8x256xf32> to vector<8x64xf32>
    %60 = vector.extract_strided_slice %55 {offsets = [0, 192], sizes = [8, 64], strides = [1, 1]} : vector<8x256xf32> to vector<8x64xf32>
    %61 = arith.mulf %58, %43 : vector<8x64xf32>
    %62 = arith.mulf %57, %59 : vector<8x64xf32>
    %63 = arith.addf %61, %62 : vector<8x64xf32>
    %64 = math.tanh %63 : vector<8x64xf32>
    %65 = arith.mulf %60, %64 : vector<8x64xf32>
    %c3_i32 = arith.constant 3 : i32
    %66 = arith.index_cast %c3_i32 : i32 to index
    %c0_18 = arith.constant 0 : index
    %c0_19 = arith.constant 0 : index
    %67 = vector.load %arg1[%66, %c0_18, %c0_19] : memref<8x8x256xf32, #tpu.memory_space<vmem>>, vector<1x8x256xf32>
    %68 = vector.shape_cast %67 : vector<1x8x256xf32> to vector<8x256xf32>
    %cst_20 = arith.constant dense<0.000000e+00> : vector<8x256xf32>
    %69 = tpu.matmul %65, %3, %cst_20 {dimension_numbers = #tpu.dot_dimension_numbers<[1], [0], [0], [1], [0, 0, 1, 1], [], []>} : vector<8x64xf32>, vector<64x256xf32>, vector<8x256xf32> -> vector<8x256xf32>
    %70 = arith.addf %68, %69 : vector<8x256xf32>
    %71 = arith.negf %70 : vector<8x256xf32>
    %72 = math.exp %71 : vector<8x256xf32>
    %cst_21 = arith.constant 1.000000e+00 : f32
    %73 = vector.broadcast %cst_21 : f32 to vector<8x256xf32>
    %74 = arith.addf %73, %72 : vector<8x256xf32>
    %75 = arith.divf %73, %74 : vector<8x256xf32>
    %76 = math.tanh %70 : vector<8x256xf32>
    %77 = vector.extract_strided_slice %75 {offsets = [0, 0], sizes = [8, 64], strides = [1, 1]} : vector<8x256xf32> to vector<8x64xf32>
    %78 = vector.extract_strided_slice %75 {offsets = [0, 64], sizes = [8, 64], strides = [1, 1]} : vector<8x256xf32> to vector<8x64xf32>
    %79 = vector.extract_strided_slice %76 {offsets = [0, 128], sizes = [8, 64], strides = [1, 1]} : vector<8x256xf32> to vector<8x64xf32>
    %80 = vector.extract_strided_slice %75 {offsets = [0, 192], sizes = [8, 64], strides = [1, 1]} : vector<8x256xf32> to vector<8x64xf32>
    %81 = arith.mulf %78, %63 : vector<8x64xf32>
    %82 = arith.mulf %77, %79 : vector<8x64xf32>
    %83 = arith.addf %81, %82 : vector<8x64xf32>
    %84 = math.tanh %83 : vector<8x64xf32>
    %85 = arith.mulf %80, %84 : vector<8x64xf32>
    %c4_i32 = arith.constant 4 : i32
    %86 = arith.index_cast %c4_i32 : i32 to index
    %c0_22 = arith.constant 0 : index
    %c0_23 = arith.constant 0 : index
    %87 = vector.load %arg1[%86, %c0_22, %c0_23] : memref<8x8x256xf32, #tpu.memory_space<vmem>>, vector<1x8x256xf32>
    %88 = vector.shape_cast %87 : vector<1x8x256xf32> to vector<8x256xf32>
    %cst_24 = arith.constant dense<0.000000e+00> : vector<8x256xf32>
    %89 = tpu.matmul %85, %3, %cst_24 {dimension_numbers = #tpu.dot_dimension_numbers<[1], [0], [0], [1], [0, 0, 1, 1], [], []>} : vector<8x64xf32>, vector<64x256xf32>, vector<8x256xf32> -> vector<8x256xf32>
    %90 = arith.addf %88, %89 : vector<8x256xf32>
    %91 = arith.negf %90 : vector<8x256xf32>
    %92 = math.exp %91 : vector<8x256xf32>
    %cst_25 = arith.constant 1.000000e+00 : f32
    %93 = vector.broadcast %cst_25 : f32 to vector<8x256xf32>
    %94 = arith.addf %93, %92 : vector<8x256xf32>
    %95 = arith.divf %93, %94 : vector<8x256xf32>
    %96 = math.tanh %90 : vector<8x256xf32>
    %97 = vector.extract_strided_slice %95 {offsets = [0, 0], sizes = [8, 64], strides = [1, 1]} : vector<8x256xf32> to vector<8x64xf32>
    %98 = vector.extract_strided_slice %95 {offsets = [0, 64], sizes = [8, 64], strides = [1, 1]} : vector<8x256xf32> to vector<8x64xf32>
    %99 = vector.extract_strided_slice %96 {offsets = [0, 128], sizes = [8, 64], strides = [1, 1]} : vector<8x256xf32> to vector<8x64xf32>
    %100 = vector.extract_strided_slice %95 {offsets = [0, 192], sizes = [8, 64], strides = [1, 1]} : vector<8x256xf32> to vector<8x64xf32>
    %101 = arith.mulf %98, %83 : vector<8x64xf32>
    %102 = arith.mulf %97, %99 : vector<8x64xf32>
    %103 = arith.addf %101, %102 : vector<8x64xf32>
    %104 = math.tanh %103 : vector<8x64xf32>
    %105 = arith.mulf %100, %104 : vector<8x64xf32>
    %c5_i32 = arith.constant 5 : i32
    %106 = arith.index_cast %c5_i32 : i32 to index
    %c0_26 = arith.constant 0 : index
    %c0_27 = arith.constant 0 : index
    %107 = vector.load %arg1[%106, %c0_26, %c0_27] : memref<8x8x256xf32, #tpu.memory_space<vmem>>, vector<1x8x256xf32>
    %108 = vector.shape_cast %107 : vector<1x8x256xf32> to vector<8x256xf32>
    %cst_28 = arith.constant dense<0.000000e+00> : vector<8x256xf32>
    %109 = tpu.matmul %105, %3, %cst_28 {dimension_numbers = #tpu.dot_dimension_numbers<[1], [0], [0], [1], [0, 0, 1, 1], [], []>} : vector<8x64xf32>, vector<64x256xf32>, vector<8x256xf32> -> vector<8x256xf32>
    %110 = arith.addf %108, %109 : vector<8x256xf32>
    %111 = arith.negf %110 : vector<8x256xf32>
    %112 = math.exp %111 : vector<8x256xf32>
    %cst_29 = arith.constant 1.000000e+00 : f32
    %113 = vector.broadcast %cst_29 : f32 to vector<8x256xf32>
    %114 = arith.addf %113, %112 : vector<8x256xf32>
    %115 = arith.divf %113, %114 : vector<8x256xf32>
    %116 = math.tanh %110 : vector<8x256xf32>
    %117 = vector.extract_strided_slice %115 {offsets = [0, 0], sizes = [8, 64], strides = [1, 1]} : vector<8x256xf32> to vector<8x64xf32>
    %118 = vector.extract_strided_slice %115 {offsets = [0, 64], sizes = [8, 64], strides = [1, 1]} : vector<8x256xf32> to vector<8x64xf32>
    %119 = vector.extract_strided_slice %116 {offsets = [0, 128], sizes = [8, 64], strides = [1, 1]} : vector<8x256xf32> to vector<8x64xf32>
    %120 = vector.extract_strided_slice %115 {offsets = [0, 192], sizes = [8, 64], strides = [1, 1]} : vector<8x256xf32> to vector<8x64xf32>
    %121 = arith.mulf %118, %103 : vector<8x64xf32>
    %122 = arith.mulf %117, %119 : vector<8x64xf32>
    %123 = arith.addf %121, %122 : vector<8x64xf32>
    %124 = math.tanh %123 : vector<8x64xf32>
    %125 = arith.mulf %120, %124 : vector<8x64xf32>
    %c6_i32 = arith.constant 6 : i32
    %126 = arith.index_cast %c6_i32 : i32 to index
    %c0_30 = arith.constant 0 : index
    %c0_31 = arith.constant 0 : index
    %127 = vector.load %arg1[%126, %c0_30, %c0_31] : memref<8x8x256xf32, #tpu.memory_space<vmem>>, vector<1x8x256xf32>
    %128 = vector.shape_cast %127 : vector<1x8x256xf32> to vector<8x256xf32>
    %cst_32 = arith.constant dense<0.000000e+00> : vector<8x256xf32>
    %129 = tpu.matmul %125, %3, %cst_32 {dimension_numbers = #tpu.dot_dimension_numbers<[1], [0], [0], [1], [0, 0, 1, 1], [], []>} : vector<8x64xf32>, vector<64x256xf32>, vector<8x256xf32> -> vector<8x256xf32>
    %130 = arith.addf %128, %129 : vector<8x256xf32>
    %131 = arith.negf %130 : vector<8x256xf32>
    %132 = math.exp %131 : vector<8x256xf32>
    %cst_33 = arith.constant 1.000000e+00 : f32
    %133 = vector.broadcast %cst_33 : f32 to vector<8x256xf32>
    %134 = arith.addf %133, %132 : vector<8x256xf32>
    %135 = arith.divf %133, %134 : vector<8x256xf32>
    %136 = math.tanh %130 : vector<8x256xf32>
    %137 = vector.extract_strided_slice %135 {offsets = [0, 0], sizes = [8, 64], strides = [1, 1]} : vector<8x256xf32> to vector<8x64xf32>
    %138 = vector.extract_strided_slice %135 {offsets = [0, 64], sizes = [8, 64], strides = [1, 1]} : vector<8x256xf32> to vector<8x64xf32>
    %139 = vector.extract_strided_slice %136 {offsets = [0, 128], sizes = [8, 64], strides = [1, 1]} : vector<8x256xf32> to vector<8x64xf32>
    %140 = vector.extract_strided_slice %135 {offsets = [0, 192], sizes = [8, 64], strides = [1, 1]} : vector<8x256xf32> to vector<8x64xf32>
    %141 = arith.mulf %138, %123 : vector<8x64xf32>
    %142 = arith.mulf %137, %139 : vector<8x64xf32>
    %143 = arith.addf %141, %142 : vector<8x64xf32>
    %144 = math.tanh %143 : vector<8x64xf32>
    %145 = arith.mulf %140, %144 : vector<8x64xf32>
    %c7_i32 = arith.constant 7 : i32
    %146 = arith.index_cast %c7_i32 : i32 to index
    %c0_34 = arith.constant 0 : index
    %c0_35 = arith.constant 0 : index
    %147 = vector.load %arg1[%146, %c0_34, %c0_35] : memref<8x8x256xf32, #tpu.memory_space<vmem>>, vector<1x8x256xf32>
    %148 = vector.shape_cast %147 : vector<1x8x256xf32> to vector<8x256xf32>
    %cst_36 = arith.constant dense<0.000000e+00> : vector<8x256xf32>
    %149 = tpu.matmul %145, %3, %cst_36 {dimension_numbers = #tpu.dot_dimension_numbers<[1], [0], [0], [1], [0, 0, 1, 1], [], []>} : vector<8x64xf32>, vector<64x256xf32>, vector<8x256xf32> -> vector<8x256xf32>
    %150 = arith.addf %148, %149 : vector<8x256xf32>
    %151 = arith.negf %150 : vector<8x256xf32>
    %152 = math.exp %151 : vector<8x256xf32>
    %cst_37 = arith.constant 1.000000e+00 : f32
    %153 = vector.broadcast %cst_37 : f32 to vector<8x256xf32>
    %154 = arith.addf %153, %152 : vector<8x256xf32>
    %155 = arith.divf %153, %154 : vector<8x256xf32>
    %156 = math.tanh %150 : vector<8x256xf32>
    %157 = vector.extract_strided_slice %155 {offsets = [0, 0], sizes = [8, 64], strides = [1, 1]} : vector<8x256xf32> to vector<8x64xf32>
    %158 = vector.extract_strided_slice %155 {offsets = [0, 64], sizes = [8, 64], strides = [1, 1]} : vector<8x256xf32> to vector<8x64xf32>
    %159 = vector.extract_strided_slice %156 {offsets = [0, 128], sizes = [8, 64], strides = [1, 1]} : vector<8x256xf32> to vector<8x64xf32>
    %160 = vector.extract_strided_slice %155 {offsets = [0, 192], sizes = [8, 64], strides = [1, 1]} : vector<8x256xf32> to vector<8x64xf32>
    %161 = arith.mulf %158, %143 : vector<8x64xf32>
    %162 = arith.mulf %157, %159 : vector<8x64xf32>
    %163 = arith.addf %161, %162 : vector<8x64xf32>
    %164 = math.tanh %163 : vector<8x64xf32>
    %165 = arith.mulf %160, %164 : vector<8x64xf32>
    %c8_i32 = arith.constant 8 : i32
    %c0_38 = arith.constant 0 : index
    %c0_39 = arith.constant 0 : index
    %166 = vector.load %arg6[%c0_38, %c0_39] : memref<8x64xf32, #tpu.memory_space<vmem>>, vector<8x64xf32>
    tpu.vector_store %arg6[%c0_38, %c0_39], %165 {strides = array<i32>} : memref<8x64xf32, #tpu.memory_space<vmem>>, vector<8x64xf32>,
    %c0_40 = arith.constant 0 : index
    %c0_41 = arith.constant 0 : index
    %167 = vector.load %arg7[%c0_40, %c0_41] : memref<8x64xf32, #tpu.memory_space<vmem>>, vector<8x64xf32>
    tpu.vector_store %arg7[%c0_40, %c0_41], %163 {strides = array<i32>} : memref<8x64xf32, #tpu.memory_space<vmem>>, vector<8x64xf32>,
    %c0_i32_42 = arith.constant 0 : i32
    %168 = arith.cmpi eq, %arg0, %c0_i32_42 : i32
    %169 = arith.extui %168 : i1 to i32
    %c0_i32_43 = arith.constant 0 : i32
    %170 = arith.cmpi ne, %169, %c0_i32_43 : i32
    scf.if %170 {
      %cst_44 = arith.constant dense<0.000000e+00> : vector<8xf32>
      %171 = vector.multi_reduction <add>, %165, %cst_44 [1] : vector<8x64xf32> to vector<8xf32>
      %172 = vector.shape_cast %171 : vector<8xf32> to vector<8x1xf32>
      %cst_45 = arith.constant 6.400000e+01 : f32
      %173 = vector.broadcast %cst_45 : f32 to vector<8x1xf32>
      %174 = arith.divf %172, %173 : vector<8x1xf32>
      %175 = vector.broadcast %174 : vector<8x1xf32> to vector<8x64xf32>
      %176 = arith.subf %165, %175 : vector<8x64xf32>
      %177 = arith.mulf %176, %176 : vector<8x64xf32>
      %cst_46 = arith.constant dense<0.000000e+00> : vector<8xf32>
      %178 = vector.multi_reduction <add>, %177, %cst_46 [1] : vector<8x64xf32> to vector<8xf32>
      %179 = vector.shape_cast %178 : vector<8xf32> to vector<8x1xf32>
      %cst_47 = arith.constant 6.400000e+01 : f32
      %180 = vector.broadcast %cst_47 : f32 to vector<8x1xf32>
      %181 = arith.divf %179, %180 : vector<8x1xf32>
      %182 = vector.broadcast %174 : vector<8x1xf32> to vector<8x64xf32>
      %183 = arith.subf %165, %182 : vector<8x64xf32>
      %cst_48 = arith.constant 9.99999974E-6 : f32
      %184 = vector.broadcast %cst_48 : f32 to vector<8x1xf32>
      %185 = arith.addf %181, %184 : vector<8x1xf32>
      %186 = math.rsqrt %185 : vector<8x1xf32>
      %187 = vector.broadcast %186 : vector<8x1xf32> to vector<8x64xf32>
      %188 = arith.mulf %183, %187 : vector<8x64xf32>
      %c0_49 = arith.constant 0 : index
      %c0_50 = arith.constant 0 : index
      %189 = vector.load %arg3[%c0_49, %c0_50] : memref<1x64xf32, #tpu.memory_space<vmem>>, vector<1x64xf32>
      %190 = vector.broadcast %189 : vector<1x64xf32> to vector<8x64xf32>
      %191 = arith.mulf %188, %190 : vector<8x64xf32>
      %c0_51 = arith.constant 0 : index
      %c0_52 = arith.constant 0 : index
      %192 = vector.load %arg4[%c0_51, %c0_52] : memref<1x64xf32, #tpu.memory_space<vmem>>, vector<1x64xf32>
      %193 = vector.broadcast %192 : vector<1x64xf32> to vector<8x64xf32>
      %194 = arith.addf %191, %193 : vector<8x64xf32>
      %c0_53 = arith.constant 0 : index
      %c0_54 = arith.constant 0 : index
      %195 = vector.load %arg5[%c0_53, %c0_54] : memref<8x64xf32, #tpu.memory_space<vmem>>, vector<8x64xf32>
      tpu.vector_store %arg5[%c0_53, %c0_54], %194 {strides = array<i32>} : memref<8x64xf32, #tpu.memory_space<vmem>>, vector<8x64xf32>,
    } else {
    }
    return
  }
  func.func @transform_0(%arg0: i32) -> (i32, i32, i32) {
    %c0_i32 = arith.constant 0 : i32
    %c0_i32_0 = arith.constant 0 : i32
    %c0_i32_1 = arith.constant 0 : i32
    return %arg0, %c0_i32, %c0_i32_0 : i32, i32, i32
  }
  func.func @transform_1(%arg0: i32) -> (i32, i32) {
    %c0_i32 = arith.constant 0 : i32
    %c0_i32_0 = arith.constant 0 : i32
    %c0_i32_1 = arith.constant 0 : i32
    return %c0_i32, %c0_i32_0 : i32, i32
  }
  func.func @transform_2(%arg0: i32) -> (i32, i32) {
    %c0_i32 = arith.constant 0 : i32
    %c0_i32_0 = arith.constant 0 : i32
    %c0_i32_1 = arith.constant 0 : i32
    return %c0_i32, %c0_i32_0 : i32, i32
  }
  func.func @transform_3(%arg0: i32) -> (i32, i32) {
    %c0_i32 = arith.constant 0 : i32
    %c0_i32_0 = arith.constant 0 : i32
    %c0_i32_1 = arith.constant 0 : i32
    return %c0_i32, %c0_i32_0 : i32, i32
  }
  func.func @transform_4(%arg0: i32) -> (i32, i32) {
    %c0_i32 = arith.constant 0 : i32
    %c0_i32_0 = arith.constant 0 : i32
    %c0_i32_1 = arith.constant 0 : i32
    return %c0_i32, %c0_i32_0 : i32, i32
  }
}

</mosaic_0001>

<bundles_post_ra>
// kernel: tpu_custom_call.1
= control target key start
LH: loop header
LB: loop body
LE: loop exit
PB: predicated region body
PF: predicated region fallthrough
CT: control target
= control target key end

     0   :  { %9 = vsyncpa [#allocation5], 0  ;;  %s1501_s0 = inlined_call_operand.hbm [shape: f32[8,8,256], index: 0, kind: input, shape index: {}]   ;;  %s1502_s1 = inlined_call_operand.hbm [shape: f32[64,256], index: 1, kind: input, shape index: {}]   ;;  %s1503_s2 = inlined_call_operand.vmem [shape: f32[1,64], index: 2, kind: input, shape index: {}]   ;;  %s1504_s3 = inlined_call_operand.vmem [shape: f32[1,64], index: 3, kind: input, shape index: {}]   ;;  %s1505_s4 = inlined_call_operand.hbm [shape: f32[8,64], index: 4, kind: output, shape index: {}]  }
   0x1   :  { %10 = vsyncpa [#allocation8], 0 }
   0x2   :  { %11 = vsyncpa [#allocation6], 0  ;;  %s1300_s15 = smov [#allocation4]   ;;  %s1228_s19 = scalar_lea.hbm %s1501_s0, 2048 }
   0x3   :  { %s17_s16 = sshll.u32 %s1300_s15, 4  ;;  %p1229_p0 = scmp.ne.s32.totalorder %s1501_s0, %s1228_s19  ;;  %s18_s16 = int_to_ptr.vmem [resolvable:$true] %s17_s16 }
   0x4   :  { %p1232_p1 = scmp.lt.u32.totalorder %s1228_s19, %s1501_s0 }
   0x6   :  { %p1234_p2 = pnand %p1232_p1, %p1229_p0 }
   0x8   :  { %1237 = shalt.err (!%p1234_p2)
}
   0x9   :  { %s1238_s24 = scalar_lea.vmem %s18_s16, 2048  ;;  %p1243_p4 = scmp.lt.s32.totalorder %s18_s16, %s18_s16 }
   0xa   :  { %p1239_p3 = scmp.ne.s32.totalorder %s18_s16, %s1238_s24  ;;  %p1244_p5 = scmp.lt.s32.totalorder %s1238_s24, %s1238_s24 }
   0xc   :  { %p1245_p6 = por %p1244_p5, %p1243_p4 }
   0xe   :  { %p1246_p7 = pnand %p1245_p6, %p1239_p3 }
  0x10   :  { %1249 = shalt.err (!%p1246_p7)
}
  0x11   :  { %s1301_s25 = smov 256   ;;  %s1302_s26 = smov 16  }
  0x12   :  { %23 = dma.hbm_to_vmem [thread:$0]  %s1501_s0, 2048, %s18_s16, [#allocation5], %s1301_s25, %s1301_s25, %s1302_s26  }
  0x13   :  { %s1303_s29 = smov [#allocation7]   ;;  %s1250_s7 = scalar_lea.hbm %s1502_s1, 2048 }
  0x14   :  { %s29_s30 = sshll.u32 %s1303_s29, 4  ;;  %p1251_p8 = scmp.ne.s32.totalorder %s1502_s1, %s1250_s7  ;;  %s30_s30 = int_to_ptr.vmem [resolvable:$true] %s29_s30 }
  0x15   :  { %p1254_p9 = scmp.lt.u32.totalorder %s1250_s7, %s1502_s1 }
  0x17   :  { %p1256_p10 = pnand %p1254_p9, %p1251_p8 }
  0x19   :  { %1259 = shalt.err (!%p1256_p10)
}
  0x1a   :  { %s1260_s12 = scalar_lea.vmem %s30_s30, 2048  ;;  %p1265_p12 = scmp.lt.s32.totalorder %s30_s30, %s30_s30 }
  0x1b   :  { %p1261_p11 = scmp.ne.s32.totalorder %s30_s30, %s1260_s12  ;;  %p1266_p13 = scmp.lt.s32.totalorder %s1260_s12, %s1260_s12 }
  0x1d   :  { %p1267_p0 = por %p1266_p13, %p1265_p12 }
  0x1f   :  { %p1268_p1 = pnand %p1267_p0, %p1261_p11 }
  0x21   :  { %1271 = shalt.err (!%p1268_p1)
}
  0x22   :  { %35 = dma.hbm_to_vmem [thread:$0]  %s1502_s1, 2048, %s30_s30, [#allocation8], %s1301_s25, %s1301_s25, %s1302_s26  }
  0x23   :  { %1294 = dma.done.wait [#allocation5], 2048  }
  0x24   :  { %1295 = vsyncadd [#allocation5], 4294965248 }
  0x25   :  { %1296 = dma.done.wait [#allocation8], 2048  }
  0x26   :  { %1297 = vsyncadd [#allocation8], 4294965248  ;;  %vm50_vm0 = vcmask 523264   ;;  %v1304_v0 = vmov 0.0   ;;  %v54_v1 = vld [vmem:[#allocation7 + $0x8] sm:$0xff]  ;;  %v56_v2 = vld [vmem:[#allocation7 + $0x18] sm:$0xff] }
  0x27   :  { %141 = vmatprep.mubr.f32.mxu0 %v1304_v0  ;;  %51 = vst.msk [vmem:[#allocation2] sm:$0xff] %vm50_vm0, %v1304_v0  ;;  %52 = vst.msk [vmem:[#allocation3] sm:$0xff] %vm50_vm0, %v1304_v0  ;;  %248 = vmatprep.mubr.f32.mxu1 %v1304_v0  ;;  %v53_v3 = vld [vmem:[#allocation7] sm:$0xff]  ;;  %v1362_v4 = vpack.c.bf16 %v56_v2, %v54_v1  ;;  %v55_v5 = vld [vmem:[#allocation7 + $0x10] sm:$0xff]  ;;  %s1305_s1 = smov 64  }
  0x28   :  { %v58_v6 = vld [vmem:[#allocation7 + $0x28] sm:$0xff]  ;;  %v60_v7 = vld [vmem:[#allocation7 + $0x38] sm:$0xff]  ;;  %v1364_v8 = vpack.c.bf16 %v55_v5, %v53_v3  ;;  %v57_v10 = vld [vmem:[#allocation7 + $0x20] sm:$0xff] }
  0x29   :  { %v1366_v9 = vpack.c.bf16 %v60_v7, %v58_v6  ;;  %v59_v11 = vld [vmem:[#allocation7 + $0x30] sm:$0xff]  ;;  %v62_v12 = vld [vmem:[#allocation7 + $0x48] sm:$0xff]  ;;  %996 = vmatprep.subr.bf16.mxu0 %v1362_v4  ;;  %v64_v13 = vld [vmem:[#allocation7 + $0x58] sm:$0xff]  ;;  %1012 = vmatprep.subr.bf16.mxu1 %v1362_v4 }
  0x2a   :  { %998 = vmatpush1.bf16.msra.mxu0 %v1364_v8  ;;  %v1371_v14 = vpack.c.bf16 %v59_v11, %v57_v10  ;;  %1014 = vmatpush1.bf16.msra.mxu1 %v1364_v8  ;;  %v1375_v15 = vpack.c.bf16 %v64_v13, %v62_v12  ;;  %v61_v16 = vld [vmem:[#allocation7 + $0x40] sm:$0xff]  ;;  %v63_v17 = vld [vmem:[#allocation7 + $0x50] sm:$0xff]  ;;  %v66_v19 = vld [vmem:[#allocation7 + $0x68] sm:$0xff] }
  0x2b   :  { %1000 = vmatprep.subr.bf16.mxu0 %v1366_v9  ;;  %1016 = vmatprep.subr.bf16.mxu1 %v1366_v9  ;;  %v68_v20 = vld [vmem:[#allocation7 + $0x78] sm:$0xff]  ;;  %v1380_v21 = vpack.c.bf16 %v63_v17, %v61_v16  ;;  %v65_v23 = vld [vmem:[#allocation7 + $0x60] sm:$0xff]  ;;  %v67_v24 = vld [vmem:[#allocation7 + $0x70] sm:$0xff] }
  0x2c   :  { %v1384_v22 = vpack.c.bf16 %v68_v20, %v66_v19  ;;  %v1388_v25 = vpack.c.bf16 %v67_v24, %v65_v23  ;;  %v71_v27 = vld [vmem:[#allocation4] sm:$0xff]  ;;  %v72_v32 = vld [vmem:[#allocation4 + $0x8] sm:$0xff]  ;;  %v177_v50 = vld [vmem:[#allocation4 + $0x10] sm:$0xff] }
  0x2d   :  { %v178_v55 = vld [vmem:[#allocation4 + $0x18] sm:$0xff]  ;;  %v280_v12 = vld [vmem:[#allocation4 + $0x20] sm:$0xff]  ;;  %v281_v19 = vld [vmem:[#allocation4 + $0x28] sm:$0xff] }
  0x2e   :  { %v70_v18 = vld [vmem:[#allocation3] sm:$0xff]  ;;  %1002 = vmatpush1.bf16.msra.mxu0 %v1371_v14  ;;  %1018 = vmatpush1.bf16.msra.mxu1 %v1371_v14  ;;  %v69_v26 = vld [vmem:[#allocation2] sm:$0xff] }
  0x2f   :  { %164 = vrot.lane.b32.xlu0 %v70_v18, %s1305_s1  ;;  %1004 = vmatprep.subr.bf16.mxu0 %v1375_v15 }
  0x30   :  { %1020 = vmatprep.subr.bf16.mxu1 %v1375_v15 }
  0x32   :  { %1006 = vmatpush1.bf16.msra.mxu0 %v1380_v21  ;;  %1022 = vmatpush1.bf16.msra.mxu1 %v1380_v21 }
  0x33   :  { %1008 = vmatprep.subr.bf16.mxu0 %v1384_v22  ;;  %1024 = vmatprep.subr.bf16.mxu1 %v1384_v22 }
  0x36   :  { %1010 = vmatpush1.bf16.msra.mxu0 %v1388_v25  ;;  %1026 = vmatpush1.bf16.msra.mxu1 %v1388_v25 }
  0x37   :  { %1028 = vmatprep.subr.bf16.mxu0 %v1362_v4  ;;  %1044 = vmatprep.subr.bf16.mxu1 %v1362_v4 }
  0x39   :  { %969 = vmatmul.mubr.msk.f32.vlgmr.msra.gmra.mrb[0].mxu0 %vm50_vm0, %v69_v26 }
  0x3a   :  { %1030 = vmatpush1.bf16.msra.mxu0 %v1364_v8  ;;  %351 = vmatprep.mubr.f32.mxu0 %v1304_v0 }
  0x3b   :  { %1032 = vmatprep.subr.bf16.mxu0 %v1366_v9 }
  0x3e   :  { %1034 = vmatpush1.bf16.msra.mxu0 %v1371_v14 }
  0x3f   :  { %1036 = vmatprep.subr.bf16.mxu0 %v1375_v15 }
  0x42   :  { %1038 = vmatpush1.bf16.msra.mxu0 %v1380_v21 }
  0x43   :  { %1040 = vmatprep.subr.bf16.mxu0 %v1384_v22 }
  0x46   :  { %1042 = vmatpush1.bf16.msra.mxu0 %v1388_v25 }
  0x47   :  { %1060 = vmatprep.subr.bf16.mxu0 %v1362_v4 }
  0xa1   :  { %v165_v41 = vpop.permute.xlu0 %164 }
 0x10c   :  { %v143_v28 = vpop.f32.mrb[0].mxu0 }
 0x10d   :  { %v148_v29 = vadd.f32 %v143_v28, %v71_v27  ;;  %v145_v30 = vpop.f32.mrb[1].mxu0 }
 0x10e   :  { %v149_v33 = vadd.f32 %v145_v30, %v72_v32 }
 0x10f   :  { %v970_v31 = vmul.f32 -1.442695, %v148_v29 }
 0x110   :  { %v971_v39 = vmul.f32 -1.442695, %v149_v33 }
 0x111   :  { %1130 = vpow2.f32 %v970_v31 }
 0x112   :  { %1132 = vtanh.f32 %v149_v33 }
 0x11b   :  { %v1131_v34 = vpop.eup %1130 }
 0x11c   :  { %v156_v35 = vadd.f32 1.0, %v1131_v34  ;;  %v1133_v36 = vpop.eup %1132 }
 0x11e   :  { %1134 = vrcp.f32 %v156_v35 }
 0x11f   :  { %1136 = vpow2.f32 %v971_v39  ;;  %v383_v39 = vld [vmem:[#allocation4 + $0x30] sm:$0xff] }
 0x128   :  { %v1135_v37 = vpop.eup %1134 }
 0x129   :  { %v168_v38 = vmul.f32 %v1135_v37, %v1133_v36  ;;  %v1137_v40 = vpop.eup %1136  ;;  %v167_v43 = vmul.f32 %v1135_v37, %v165_v41 }
 0x12a   :  { %v157_v42 = vadd.f32 1.0, %v1137_v40 }
 0x12b   :  { %170 = vrot.lane.b32.xlu0 %v168_v38, %s1305_s1 }
 0x12c   :  { %1138 = vrcp.f32 %v157_v42 }
 0x136   :  { %v1139_v46 = vpop.eup %1138 }
 0x19d   :  { %v171_v44 = vpop.permute.xlu0 %170 }
 0x19e   :  { %v173_v45 = vadd.f32 %v171_v44, %v167_v43  ;;  %v384_v44 = vld [vmem:[#allocation4 + $0x38] sm:$0xff] }
 0x1a0   :  { %1140 = vtanh.f32 %v173_v45 }
 0x1aa   :  { %v1141_v47 = vpop.eup %1140 }
 0x1ab   :  { %v175_v48 = vmul.f32 %v1141_v47, %v1139_v46 }
 0x1ad   :  { %180 = vrot.lane.b32.xlu1 %v175_v48, %s1305_s1 }
 0x21f   :  { %v181_v49 = vpop.permute.xlu1 %180 }
 0x220   :  { %972 = vmatmul.mubr.msk.f32.vlgmr.msra.gmra.mrb[0].mxu1 %vm50_vm0, %v181_v49 }
 0x221   :  { %1046 = vmatpush1.bf16.msra.mxu1 %v1364_v8  ;;  %454 = vmatprep.mubr.f32.mxu1 %v1304_v0 }
 0x222   :  { %1048 = vmatprep.subr.bf16.mxu1 %v1366_v9 }
 0x225   :  { %1050 = vmatpush1.bf16.msra.mxu1 %v1371_v14 }
 0x226   :  { %1052 = vmatprep.subr.bf16.mxu1 %v1375_v15 }
 0x229   :  { %1054 = vmatpush1.bf16.msra.mxu1 %v1380_v21 }
 0x22a   :  { %1056 = vmatprep.subr.bf16.mxu1 %v1384_v22 }
 0x22d   :  { %1058 = vmatpush1.bf16.msra.mxu1 %v1388_v25 }
 0x22e   :  { %1076 = vmatprep.subr.bf16.mxu1 %v1362_v4 }
 0x2f3   :  { %v250_v51 = vpop.f32.mrb[0].mxu1 }
 0x2f4   :  { %v255_v52 = vadd.f32 %v250_v51, %v177_v50  ;;  %v252_v53 = vpop.f32.mrb[1].mxu1 }
 0x2f5   :  { %v256_v56 = vadd.f32 %v252_v53, %v178_v55 }
 0x2f6   :  { %v973_v54 = vmul.f32 -1.442695, %v255_v52 }
 0x2f7   :  { %v974_v62 = vmul.f32 -1.442695, %v256_v56 }
 0x2f8   :  { %1142 = vpow2.f32 %v973_v54 }
 0x2f9   :  { %1144 = vtanh.f32 %v256_v56 }
 0x302   :  { %v1143_v57 = vpop.eup %1142 }
 0x303   :  { %v263_v58 = vadd.f32 1.0, %v1143_v57  ;;  %v1145_v59 = vpop.eup %1144 }
 0x305   :  { %1146 = vrcp.f32 %v263_v58 }
 0x306   :  { %1148 = vpow2.f32 %v974_v62 }
 0x30f   :  { %v1147_v60 = vpop.eup %1146 }
 0x310   :  { %v271_v61 = vmul.f32 %v1147_v60, %v1145_v59  ;;  %v1149_v63 = vpop.eup %1148  ;;  %v270_v2 = vmul.f32 %v1147_v60, %v173_v45  ;;  %v486_v60 = vld [vmem:[#allocation4 + $0x40] sm:$0xff] }
 0x311   :  { %v264_v1 = vadd.f32 1.0, %v1149_v63 }
 0x312   :  { %273 = vrot.lane.b32.xlu1 %v271_v61, %s1305_s1 }
 0x313   :  { %1150 = vrcp.f32 %v264_v1 }
 0x31d   :  { %v1151_v6 = vpop.eup %1150 }
 0x384   :  { %v274_v3 = vpop.permute.xlu1 %273 }
 0x385   :  { %v276_v5 = vadd.f32 %v274_v3, %v270_v2  ;;  %v487_v2 = vld [vmem:[#allocation4 + $0x48] sm:$0xff] }
 0x387   :  { %1152 = vtanh.f32 %v276_v5 }
 0x391   :  { %v1153_v7 = vpop.eup %1152 }
 0x392   :  { %v278_v10 = vmul.f32 %v1153_v7, %v1151_v6 }
 0x394   :  { %283 = vrot.lane.b32.xlu0 %v278_v10, %s1305_s1 }
 0x406   :  { %v284_v11 = vpop.permute.xlu0 %283 }
 0x407   :  { %975 = vmatmul.mubr.msk.f32.vlgmr.msra.gmra.mrb[2].mxu0 %vm50_vm0, %v284_v11 }
 0x408   :  { %1062 = vmatpush1.bf16.msra.mxu0 %v1364_v8  ;;  %557 = vmatprep.mubr.f32.mxu0 %v1304_v0 }
 0x409   :  { %1064 = vmatprep.subr.bf16.mxu0 %v1366_v9 }
 0x40c   :  { %1066 = vmatpush1.bf16.msra.mxu0 %v1371_v14 }
 0x40d   :  { %1068 = vmatprep.subr.bf16.mxu0 %v1375_v15 }
 0x410   :  { %1070 = vmatpush1.bf16.msra.mxu0 %v1380_v21 }
 0x411   :  { %1072 = vmatprep.subr.bf16.mxu0 %v1384_v22 }
 0x414   :  { %1074 = vmatpush1.bf16.msra.mxu0 %v1388_v25 }
 0x415   :  { %1092 = vmatprep.subr.bf16.mxu0 %v1362_v4 }
 0x4da   :  { %v353_v13 = vpop.f32.mrb[2].mxu0 }
 0x4db   :  { %v358_v16 = vadd.f32 %v353_v13, %v280_v12  ;;  %v355_v17 = vpop.f32.mrb[3].mxu0 }
 0x4dc   :  { %v359_v20 = vadd.f32 %v355_v17, %v281_v19 }
 0x4dd   :  { %v976_v18 = vmul.f32 -1.442695, %v358_v16 }
 0x4de   :  { %v977_v29 = vmul.f32 -1.442695, %v359_v20 }
 0x4df   :  { %1154 = vpow2.f32 %v976_v18 }
 0x4e0   :  { %1156 = vtanh.f32 %v359_v20 }
 0x4e9   :  { %v1155_v23 = vpop.eup %1154 }
 0x4ea   :  { %v366_v24 = vadd.f32 1.0, %v1155_v23  ;;  %v1157_v26 = vpop.eup %1156 }
 0x4ec   :  { %1158 = vrcp.f32 %v366_v24 }
 0x4ed   :  { %1160 = vpow2.f32 %v977_v29 }
 0x4f6   :  { %v1159_v27 = vpop.eup %1158 }
 0x4f7   :  { %v374_v28 = vmul.f32 %v1159_v27, %v1157_v26  ;;  %v1161_v30 = vpop.eup %1160  ;;  %v373_v32 = vmul.f32 %v1159_v27, %v276_v5  ;;  %v589_v27 = vld [vmem:[#allocation4 + $0x50] sm:$0xff] }
 0x4f8   :  { %v367_v31 = vadd.f32 1.0, %v1161_v30 }
 0x4f9   :  { %376 = vrot.lane.b32.xlu1 %v374_v28, %s1305_s1 }
 0x4fa   :  { %1162 = vrcp.f32 %v367_v31 }
 0x504   :  { %v1163_v35 = vpop.eup %1162 }
 0x56b   :  { %v377_v33 = vpop.permute.xlu1 %376 }
 0x56c   :  { %v379_v34 = vadd.f32 %v377_v33, %v373_v32 }
 0x56e   :  { %1164 = vtanh.f32 %v379_v34 }
 0x578   :  { %v1165_v36 = vpop.eup %1164 }
 0x579   :  { %v381_v37 = vmul.f32 %v1165_v36, %v1163_v35 }
 0x57b   :  { %386 = vrot.lane.b32.xlu0 %v381_v37, %s1305_s1 }
 0x5ed   :  { %v387_v38 = vpop.permute.xlu0 %386 }
 0x5ee   :  { %978 = vmatmul.mubr.msk.f32.vlgmr.msra.gmra.mrb[2].mxu1 %vm50_vm0, %v387_v38 }
 0x5ef   :  { %1078 = vmatpush1.bf16.msra.mxu1 %v1364_v8  ;;  %660 = vmatprep.mubr.f32.mxu1 %v1304_v0 }
 0x5f0   :  { %1080 = vmatprep.subr.bf16.mxu1 %v1366_v9 }
 0x5f3   :  { %1082 = vmatpush1.bf16.msra.mxu1 %v1371_v14 }
 0x5f4   :  { %1084 = vmatprep.subr.bf16.mxu1 %v1375_v15 }
 0x5f7   :  { %1086 = vmatpush1.bf16.msra.mxu1 %v1380_v21 }
 0x5f8   :  { %1088 = vmatprep.subr.bf16.mxu1 %v1384_v22 }
 0x5fb   :  { %1090 = vmatpush1.bf16.msra.mxu1 %v1388_v25 }
 0x5fc   :  { %1108 = vmatprep.subr.bf16.mxu1 %v1362_v4 }
 0x6c1   :  { %v456_v40 = vpop.f32.mrb[2].mxu1 }
 0x6c2   :  { %v461_v41 = vadd.f32 %v456_v40, %v383_v39  ;;  %v458_v42 = vpop.f32.mrb[3].mxu1 }
 0x6c3   :  { %v462_v45 = vadd.f32 %v458_v42, %v384_v44 }
 0x6c4   :  { %v979_v43 = vmul.f32 -1.442695, %v461_v41  ;;  %v692_v41 = vld [vmem:[#allocation4 + $0x60] sm:$0xff] }
 0x6c5   :  { %v980_v51 = vmul.f32 -1.442695, %v462_v45 }
 0x6c6   :  { %1166 = vpow2.f32 %v979_v43 }
 0x6c7   :  { %1168 = vtanh.f32 %v462_v45 }
 0x6d0   :  { %v1167_v46 = vpop.eup %1166 }
 0x6d1   :  { %v469_v47 = vadd.f32 1.0, %v1167_v46  ;;  %v1169_v48 = vpop.eup %1168  ;;  %v693_v46 = vld [vmem:[#allocation4 + $0x68] sm:$0xff] }
 0x6d3   :  { %1170 = vrcp.f32 %v469_v47 }
 0x6d4   :  { %1172 = vpow2.f32 %v980_v51 }
 0x6dd   :  { %v1171_v49 = vpop.eup %1170 }
 0x6de   :  { %v477_v50 = vmul.f32 %v1171_v49, %v1169_v48  ;;  %v1173_v4 = vpop.eup %1172  ;;  %v476_v53 = vmul.f32 %v1171_v49, %v379_v34 }
 0x6df   :  { %v470_v52 = vadd.f32 1.0, %v1173_v4 }
 0x6e0   :  { %479 = vrot.lane.b32.xlu1 %v477_v50, %s1305_s1 }
 0x6e1   :  { %1174 = vrcp.f32 %v470_v52 }
 0x6eb   :  { %v1175_v56 = vpop.eup %1174 }
 0x752   :  { %v480_v54 = vpop.permute.xlu1 %479 }
 0x753   :  { %v482_v55 = vadd.f32 %v480_v54, %v476_v53 }
 0x755   :  { %1176 = vtanh.f32 %v482_v55 }
 0x75f   :  { %v1177_v57 = vpop.eup %1176 }
 0x760   :  { %v484_v58 = vmul.f32 %v1177_v57, %v1175_v56 }
 0x762   :  { %489 = vrot.lane.b32.xlu0 %v484_v58, %s1305_s1 }
 0x7d4   :  { %v490_v59 = vpop.permute.xlu0 %489 }
 0x7d5   :  { %981 = vmatmul.mubr.msk.f32.vlgmr.msra.gmra.mrb[4].mxu0 %vm50_vm0, %v490_v59 }
 0x7d6   :  { %1094 = vmatpush1.bf16.msra.mxu0 %v1364_v8  ;;  %763 = vmatprep.mubr.f32.mxu0 %v1304_v0 }
 0x7d7   :  { %1096 = vmatprep.subr.bf16.mxu0 %v1366_v9 }
 0x7da   :  { %1098 = vmatpush1.bf16.msra.mxu0 %v1371_v14 }
 0x7db   :  { %1100 = vmatprep.subr.bf16.mxu0 %v1375_v15 }
 0x7de   :  { %1102 = vmatpush1.bf16.msra.mxu0 %v1380_v21 }
 0x7df   :  { %1104 = vmatprep.subr.bf16.mxu0 %v1384_v22 }
 0x7e2   :  { %1106 = vmatpush1.bf16.msra.mxu0 %v1388_v25 }
 0x8a8   :  { %v559_v61 = vpop.f32.mrb[4].mxu0 }
 0x8a9   :  { %v564_v62 = vadd.f32 %v559_v61, %v486_v60  ;;  %v561_v63 = vpop.f32.mrb[5].mxu0 }
 0x8aa   :  { %v565_v3 = vadd.f32 %v561_v63, %v487_v2 }
 0x8ab   :  { %v982_v1 = vmul.f32 -1.442695, %v564_v62  ;;  %v795_v62 = vld [vmem:[#allocation4 + $0x70] sm:$0xff] }
 0x8ac   :  { %v983_v12 = vmul.f32 -1.442695, %v565_v3 }
 0x8ad   :  { %1178 = vpow2.f32 %v982_v1 }
 0x8ae   :  { %1180 = vtanh.f32 %v565_v3 }
 0x8b7   :  { %v1179_v5 = vpop.eup %1178 }
 0x8b8   :  { %v572_v6 = vadd.f32 1.0, %v1179_v5  ;;  %v1181_v7 = vpop.eup %1180  ;;  %v796_v5 = vld [vmem:[#allocation4 + $0x78] sm:$0xff] }
 0x8ba   :  { %1182 = vrcp.f32 %v572_v6 }
 0x8bb   :  { %1184 = vpow2.f32 %v983_v12 }
 0x8c4   :  { %v1183_v10 = vpop.eup %1182 }
 0x8c5   :  { %v580_v11 = vmul.f32 %v1183_v10, %v1181_v7  ;;  %v1185_v13 = vpop.eup %1184  ;;  %v579_v17 = vmul.f32 %v1183_v10, %v482_v55 }
 0x8c6   :  { %v573_v16 = vadd.f32 1.0, %v1185_v13 }
 0x8c7   :  { %582 = vrot.lane.b32.xlu1 %v580_v11, %s1305_s1 }
 0x8c8   :  { %1186 = vrcp.f32 %v573_v16 }
 0x8d2   :  { %v1187_v20 = vpop.eup %1186 }
 0x939   :  { %v583_v18 = vpop.permute.xlu1 %582 }
 0x93a   :  { %v585_v19 = vadd.f32 %v583_v18, %v579_v17 }
 0x93c   :  { %1188 = vtanh.f32 %v585_v19 }
 0x946   :  { %v1189_v23 = vpop.eup %1188 }
 0x947   :  { %v587_v24 = vmul.f32 %v1189_v23, %v1187_v20 }
 0x949   :  { %592 = vrot.lane.b32.xlu0 %v587_v24, %s1305_s1 }
 0x9bb   :  { %v593_v26 = vpop.permute.xlu0 %592 }
 0x9bc   :  { %984 = vmatmul.mubr.msk.f32.vlgmr.msra.gmra.mrb[4].mxu1 %vm50_vm0, %v593_v26 }
 0x9bd   :  { %1110 = vmatpush1.bf16.msra.mxu1 %v1364_v8  ;;  %866 = vmatprep.mubr.f32.mxu1 %v1304_v0  ;;  %v590_v8 = vld [vmem:[#allocation4 + $0x58] sm:$0xff] }
 0x9be   :  { %1112 = vmatprep.subr.bf16.mxu1 %v1366_v9 }
 0x9c1   :  { %1114 = vmatpush1.bf16.msra.mxu1 %v1371_v14 }
 0x9c2   :  { %1116 = vmatprep.subr.bf16.mxu1 %v1375_v15 }
 0x9c5   :  { %1118 = vmatpush1.bf16.msra.mxu1 %v1380_v21 }
 0x9c6   :  { %1120 = vmatprep.subr.bf16.mxu1 %v1384_v22 }
 0x9c9   :  { %1122 = vmatpush1.bf16.msra.mxu1 %v1388_v25 }
 0xa8f   :  { %v662_v28 = vpop.f32.mrb[4].mxu1 }
 0xa90   :  { %v667_v29 = vadd.f32 %v662_v28, %v589_v27  ;;  %v664_v30 = vpop.f32.mrb[5].mxu1 }
 0xa91   :  { %v668_v0 = vadd.f32 %v664_v30, %v590_v8  ;;  %v993_v30 = vld [vmem:[%s1503_s2] ss:$0 sm:$0xff]  ;;  %s1306_s2 = smov [#allocation9]  }
 0xa92   :  { %v985_v31 = vmul.f32 -1.442695, %v667_v29  ;;  %s959_s18 = sshll.u32 %s1306_s2, 4  ;;  %s960_s18 = int_to_ptr.vmem [resolvable:$true] %s959_s18 }
 0xa93   :  { %v986_v21 = vmul.f32 -1.442695, %v668_v0  ;;  %p1277_p3 = scmp.lt.s32.totalorder %s960_s18, %s960_s18 }
 0xa94   :  { %1190 = vpow2.f32 %v985_v31 }
 0xa95   :  { %1192 = vtanh.f32 %v668_v0 }
 0xa9e   :  { %v1191_v32 = vpop.eup %1190 }
 0xa9f   :  { %v675_v9 = vadd.f32 1.0, %v1191_v32  ;;  %v1193_v14 = vpop.eup %1192 }
 0xaa1   :  { %1194 = vrcp.f32 %v675_v9 }
 0xaa2   :  { %1196 = vpow2.f32 %v986_v21 }
 0xaab   :  { %v1195_v15 = vpop.eup %1194 }
 0xaac   :  { %v683_v33 = vmul.f32 %v1195_v15, %v1193_v14  ;;  %v1197_v22 = vpop.eup %1196  ;;  %v682_v34 = vmul.f32 %v1195_v15, %v585_v19  ;;  %v994_v15 = vld [vmem:[%s1504_s3] ss:$0 sm:$0xff]  ;;  %s1272_s3 = scalar_lea.vmem %s960_s18, 128 }
 0xaad   :  { %v676_v25 = vadd.f32 1.0, %v1197_v22  ;;  %p1273_p2 = scmp.ne.s32.totalorder %s960_s18, %s1272_s3  ;;  %p1278_p4 = scmp.lt.s32.totalorder %s1272_s3, %s1272_s3 }
 0xaae   :  { %685 = vrot.lane.b32.xlu1 %v683_v33, %s1305_s1 }
 0xaaf   :  { %1198 = vrcp.f32 %v676_v25  ;;  %p1279_p5 = por %p1278_p4, %p1277_p3 }
 0xab1   :  { %p1280_p6 = pnand %p1279_p5, %p1273_p2 }
 0xab9   :  { %v1199_v37 = vpop.eup %1198 }
 0xb20   :  { %v686_v35 = vpop.permute.xlu1 %685 }
 0xb21   :  { %v688_v36 = vadd.f32 %v686_v35, %v682_v34 }
 0xb23   :  { %1200 = vtanh.f32 %v688_v36 }
 0xb2d   :  { %v1201_v38 = vpop.eup %1200 }
 0xb2e   :  { %v690_v39 = vmul.f32 %v1201_v38, %v1199_v37 }
 0xb30   :  { %695 = vrot.lane.b32.xlu0 %v690_v39, %s1305_s1 }
 0xba2   :  { %v696_v40 = vpop.permute.xlu0 %695 }
 0xba3   :  { %987 = vmatmul.mubr.msk.f32.vlgmr.msra.gmra.mrb[6].mxu0 %vm50_vm0, %v696_v40 }
 0xc76   :  { %v765_v42 = vpop.f32.mrb[6].mxu0 }
 0xc77   :  { %v770_v43 = vadd.f32 %v765_v42, %v692_v41  ;;  %v767_v44 = vpop.f32.mrb[7].mxu0 }
 0xc78   :  { %v771_v47 = vadd.f32 %v767_v44, %v693_v46 }
 0xc79   :  { %v988_v45 = vmul.f32 -1.442695, %v770_v43 }
 0xc7a   :  { %v989_v52 = vmul.f32 -1.442695, %v771_v47 }
 0xc7b   :  { %1202 = vpow2.f32 %v988_v45 }
 0xc7c   :  { %1204 = vtanh.f32 %v771_v47 }
 0xc85   :  { %v1203_v48 = vpop.eup %1202 }
 0xc86   :  { %v778_v49 = vadd.f32 1.0, %v1203_v48  ;;  %v1205_v50 = vpop.eup %1204 }
 0xc88   :  { %1206 = vrcp.f32 %v778_v49 }
 0xc89   :  { %1208 = vpow2.f32 %v989_v52 }
 0xc92   :  { %v1207_v51 = vpop.eup %1206 }
 0xc93   :  { %v786_v4 = vmul.f32 %v1207_v51, %v1205_v50  ;;  %v1209_v53 = vpop.eup %1208  ;;  %v785_v55 = vmul.f32 %v1207_v51, %v688_v36 }
 0xc94   :  { %v779_v54 = vadd.f32 1.0, %v1209_v53 }
 0xc95   :  { %788 = vrot.lane.b32.xlu1 %v786_v4, %s1305_s1 }
 0xc96   :  { %1210 = vrcp.f32 %v779_v54 }
 0xca0   :  { %v1211_v58 = vpop.eup %1210 }
 0xd07   :  { %v789_v56 = vpop.permute.xlu1 %788 }
 0xd08   :  { %v791_v57 = vadd.f32 %v789_v56, %v785_v55 }
 0xd0a   :  { %1212 = vtanh.f32 %v791_v57 }
 0xd14   :  { %v1213_v59 = vpop.eup %1212 }
 0xd15   :  { %v793_v60 = vmul.f32 %v1213_v59, %v1211_v58 }
 0xd17   :  { %798 = vrot.lane.b32.xlu0 %v793_v60, %s1305_s1 }
 0xd89   :  { %v799_v61 = vpop.permute.xlu0 %798 }
 0xd8a   :  { %990 = vmatmul.mubr.msk.f32.vlgmr.msra.gmra.mrb[6].mxu1 %vm50_vm0, %v799_v61 }
 0xe5d   :  { %v868_v63 = vpop.f32.mrb[6].mxu1 }
 0xe5e   :  { %v873_v1 = vadd.f32 %v868_v63, %v795_v62  ;;  %v870_v2 = vpop.f32.mrb[7].mxu1 }
 0xe5f   :  { %v874_v6 = vadd.f32 %v870_v2, %v796_v5 }
 0xe60   :  { %v991_v3 = vmul.f32 -1.442695, %v873_v1 }
 0xe61   :  { %v992_v16 = vmul.f32 -1.442695, %v874_v6 }
 0xe62   :  { %1214 = vpow2.f32 %v991_v3 }
 0xe63   :  { %1216 = vtanh.f32 %v874_v6 }
 0xe6c   :  { %v1215_v7 = vpop.eup %1214 }
 0xe6d   :  { %v881_v10 = vadd.f32 1.0, %v1215_v7  ;;  %v1217_v11 = vpop.eup %1216 }
 0xe6f   :  { %1218 = vrcp.f32 %v881_v10 }
 0xe70   :  { %1220 = vpow2.f32 %v992_v16 }
 0xe79   :  { %v1219_v12 = vpop.eup %1218 }
 0xe7a   :  { %v889_v13 = vmul.f32 %v1219_v12, %v1217_v11  ;;  %v1221_v17 = vpop.eup %1220  ;;  %v888_v19 = vmul.f32 %v1219_v12, %v791_v57 }
 0xe7b   :  { %v882_v18 = vadd.f32 1.0, %v1221_v17 }
 0xe7c   :  { %891 = vrot.lane.b32.xlu1 %v889_v13, %s1305_s1 }
 0xe7d   :  { %1222 = vrcp.f32 %v882_v18 }
 0xe87   :  { %v1223_v24 = vpop.eup %1222 }
 0xeee   :  { %v892_v20 = vpop.permute.xlu1 %891 }
 0xeef   :  { %v894_v23 = vadd.f32 %v892_v20, %v888_v19 }
 0xef1   :  { %1224 = vtanh.f32 %v894_v23 }
 0xefb   :  { %v1225_v26 = vpop.eup %1224 }
 0xefc   :  { %v896_v27 = vmul.f32 %v1225_v26, %v1223_v24 }
 0xefe   :  { %898 = vrot.lane.b32.xlu0 %v896_v27, %s1305_s1 }
 0xf70   :  { %v899_v28 = vpop.permute.xlu0 %898 }
 0xf71   :  { %901 = vst.msk [vmem:[#allocation2] sm:$0xff] %vm50_vm0, %v899_v28  ;;  %v910_v29 = vsel %vm50_vm0, %v899_v28, 0.0 }
 0xf72   :  { %911 = vadd.xlane.f32.xlu1 %v910_v29 }
 0xf83   :  { %934 = vrot.lane.b32.xlu1 %v993_v30, %s1305_s1 }
 0xfff   :  { %v912_v31 = vpop.xlane.xlu1 %911 }
0x1000   :  { %v914_v8 = vmul.f32 0.015625, %v912_v31 }
0x1002   :  { %v915_v0 = vsub.f32 %v896_v27, %v914_v8 }
0x1003   :  { %v935_v34 = vpop.permute.xlu1 %934 }
0x1004   :  { %v916_v32 = vmul.f32 %v915_v0, %v915_v0 }
0x1006   :  { %918 = vrot.lane.b32.xlu0 %v916_v32, %s1305_s1 }
0x1078   :  { %v919_v9 = vpop.permute.xlu0 %918 }
0x1079   :  { %v921_v14 = vsel %vm50_vm0, %v919_v9, 0.0 }
0x107a   :  { %922 = vadd.xlane.f32.xlu0 %v921_v14 }
0x1090   :  { %944 = vrot.lane.b32.xlu0 %v994_v15, %s1305_s1 }
0x1107   :  { %v923_v33 = vpop.xlane.xlu0 %922 }
0x1108   :  { %v924_v21 = vmul.f32 0.015625, %v923_v33 }
0x110a   :  { %v925_v22 = vadd.f32 1e-05, %v924_v21 }
0x110b   :  { %v945_v36 = vpop.permute.xlu0 %944 }
0x110c   :  { %1226 = vrsqrt.f32 %v925_v22 }
0x1116   :  { %v1227_v25 = vpop.eup %1226 }
0x1117   :  { %v927_v35 = vmul.f32 %v1227_v25, %v915_v0 }
0x1119   :  { %v937_v37 = vmul.f32 %v935_v34, %v927_v35 }
0x111b   :  { %v947_v38 = vadd.f32 %v945_v36, %v937_v37 }
0x111d   :  { %949 = vrot.lane.b32.xlu1 %v947_v38, %s1305_s1 }
0x1121   :  { %903 = vrot.lane.b32.xlu1 %v894_v23, %s1305_s1 }
0x118f   :  { %v950_v39 = vpop.permute.xlu1 %949 }
0x1190   :  { %952 = vst.msk [vmem:[#allocation9] sm:$0xff] %vm50_vm0, %v950_v39 }
0x1191   :  { %1283 = shalt.err (!%p1280_p6)
}
0x1192   :  { %s1284_s21 = scalar_lea.hbm %s1505_s4, 128 }
0x1193   :  { %p1285_p7 = scmp.ne.s32.totalorder %s1505_s4, %s1284_s21  ;;  %p1288_p8 = scmp.lt.u32.totalorder %s1284_s21, %s1505_s4 }
0x1195   :  { %p1290_p9 = pnand %p1288_p8, %p1285_p7 }
0x1197   :  { %1293 = shalt.err (!%p1290_p9)
}
0x1198   :  { %962 = dma.vmem_to_hbm [thread:$0]  %s960_s18, 128, %s1505_s4, [#allocation6]   ;;  %v904_v40 = vpop.permute.xlu1 %903 }
0x1199   :  { %906 = vst.msk [vmem:[#allocation3] sm:$0xff] %vm50_vm0, %v904_v40 }
0x119a   :  { %1298 = dma.done.wait [#allocation6], 128  }
0x119b   :  { %1299 = vsyncadd [#allocation6], 4294967168 }
0x119c   :  { %966 = vsyncpa [#allocation5], 1 }
0x119d   :  { %967 = vsyncpa [#allocation8], 1 }
0x119e   :  { %968 = vsyncpa [#allocation6], 1 }

</bundles_post_ra>
